<compile_context>
chip_gen: v7x
topology: tpu7x:2x2x1
jax: 0.10.0
libtpu: 0.0.40
codegen_flags: <defaults>
</compile_context>

<pallas_src>
import jax
import jax.numpy as jnp
from jax.experimental import pallas as pl
from jax.experimental.pallas import tpu as pltpu

T, B, OBS, HID, ACT = 4, 8, 16, 64, 8   # timesteps, batch, obs dim, hidden, actions
H2 = 2 * HID                            # 128: fused actor|critic hidden width (lane-dense)


def policy_act_kernel(x_ref, w1_ref, w2_ref, wh_ref, b_ref, vlp_ref, act_ref):
    x = x_ref[...]          # (B, OBS)
    b = b_ref[...]          # (3, 2*HID): rows = [bias1 | bias2 | head bias (padded)]

    # Layer 1: fused actor|critic first layers -> single lane-dense (B, 128) slab.
    h1 = jnp.tanh(jnp.dot(x, w1_ref[...], preferred_element_type=jnp.float32)
                  + b[0:1, :])

    # Layer 2: block-diagonal (128, 128) fused second layers -> one MXU tile.
    h2 = jnp.tanh(jnp.dot(h1, w2_ref[...], preferred_element_type=jnp.float32)
                  + b[1:2, :])

    # Fused heads: cols [0:ACT] = Categorical logits (actor rows of wh),
    #              col  [ACT]   = value (critic rows of wh).
    heads = (jnp.dot(h2, wh_ref[...], preferred_element_type=jnp.float32)
             + b[2:3, :ACT + 1])
    logits = heads[:, :ACT]
    value = heads[:, ACT:ACT + 1]

    # deterministic action = dist.mode() = argmax (first-max tie-break, like argmax)
    m = jnp.max(logits, axis=-1, keepdims=True)
    ids = jax.lax.broadcasted_iota(jnp.int32, logits.shape, 1)
    idx = jnp.min(jnp.where(logits == m, ids, jnp.int32(ACT)),
                  axis=-1, keepdims=True)

    # log_prob(action) = logits[argmax] - logsumexp = m - lse   (exactly equivalent)
    lse = jnp.log(jnp.sum(jnp.exp(logits - m), axis=-1, keepdims=True)) + m

    vlp_ref[...] = jnp.concatenate([value, m - lse], axis=-1)   # (B, 2): [value, logp]
    act_ref[...] = idx                                          # (B, 1) int32


def make_params(key):
    """Deterministic synthetic parameters (shapes from MLPBase / Categorical)."""
    ks = jax.random.split(key, 6)

    def lin(k, fan_in, fan_out, gain=1.0):
        return gain * jax.random.normal(k, (fan_in, fan_out), jnp.float32) / jnp.sqrt(fan_in)

    return dict(
        wa1=lin(ks[0], OBS, HID), ba1=jnp.zeros((1, HID), jnp.float32),
        wa2=lin(ks[1], HID, HID), ba2=jnp.zeros((1, HID), jnp.float32),
        wc1=lin(ks[2], OBS, HID), bc1=jnp.zeros((1, HID), jnp.float32),
        wc2=lin(ks[3], HID, HID), bc2=jnp.zeros((1, HID), jnp.float32),
        wv=lin(ks[4], HID, 1),    bv=jnp.zeros((1, 1), jnp.float32),
        wd=lin(ks[5], HID, ACT, gain=0.01), bd=jnp.zeros((1, ACT), jnp.float32),
    )


def pack_params(p):
    """Pack 13 parameter arrays into 4 lane-friendly slabs (done once, outside kernel)."""
    # layer-1: [wa1 | wc1]  -> (OBS, 2*HID)
    w1 = jnp.concatenate([p["wa1"], p["wc1"]], axis=1)
    # layer-2: block-diag(wa2, wc2) -> (2*HID, 2*HID)
    w2 = jnp.zeros((H2, H2), jnp.float32)
    w2 = w2.at[:HID, :HID].set(p["wa2"]).at[HID:, HID:].set(p["wc2"])
    # heads: actor rows -> wd (cols 0:ACT); critic rows -> wv (col ACT)
    wh = jnp.zeros((H2, ACT + 1), jnp.float32)
    wh = wh.at[:HID, :ACT].set(p["wd"]).at[HID:, ACT:ACT + 1].set(p["wv"])
    # all biases in one (3, 2*HID) slab
    b1 = jnp.concatenate([p["ba1"], p["bc1"]], axis=1)
    b2 = jnp.concatenate([p["ba2"], p["bc2"]], axis=1)
    bh = jnp.zeros((1, H2), jnp.float32)
    bh = bh.at[:, :ACT].set(p["bd"]).at[:, ACT:ACT + 1].set(p["bv"])
    biases = jnp.concatenate([b1, b2, bh], axis=0)
    return dict(w1=w1, w2=w2, wh=wh, biases=biases)


def policy_act(packed, inputs, rnn_hxs, masks):
    """inputs: (T, B, OBS). Grid over T amortizes launch + weight DMA; weights stay
    resident in VMEM (constant index_map). rnn_hxs / masks only matter for recurrent
    bases (GRU) and are passed through for the non-recurrent MLPBase."""
    # TODO(synk): stochastic sampling (dist.sample) needs pltpu PRNG; deterministic mode only.
    const2 = lambda t: (0, 0)
    vlp, action = pl.pallas_call(
        policy_act_kernel,
        out_shape=(jax.ShapeDtypeStruct((T, B, 2), jnp.float32),
                   jax.ShapeDtypeStruct((T, B, 1), jnp.int32)),
        grid=(T,),
        in_specs=[pl.BlockSpec((None, B, OBS), lambda t: (t, 0, 0)),
                  pl.BlockSpec((OBS, H2), const2),
                  pl.BlockSpec((H2, H2), const2),
                  pl.BlockSpec((H2, ACT + 1), const2),
                  pl.BlockSpec((3, H2), const2)],
        out_specs=(pl.BlockSpec((None, B, 2), lambda t: (t, 0, 0)),
                   pl.BlockSpec((None, B, 1), lambda t: (t, 0, 0))),
        compiler_params=pltpu.CompilerParams(
            dimension_semantics=("parallel",)),
    )(inputs, packed["w1"], packed["w2"], packed["wh"], packed["biases"])
    value = vlp[..., 0:1]
    logp = vlp[..., 1:2]
    return value, action, logp, rnn_hxs


def policy_act_ref(params, inputs, rnn_hxs, masks):
    """Pure-JAX reference of the same forward pass (unfused weights)."""
    p = params
    ha = jnp.tanh(inputs @ p["wa1"] + p["ba1"])
    ha = jnp.tanh(ha @ p["wa2"] + p["ba2"])
    hc = jnp.tanh(inputs @ p["wc1"] + p["bc1"])
    hc = jnp.tanh(hc @ p["wc2"] + p["bc2"])
    value = hc @ p["wv"] + p["bv"]
    logits = ha @ p["wd"] + p["bd"]
    action = jnp.argmax(logits, axis=-1, keepdims=True).astype(jnp.int32)
    logp = jax.nn.log_softmax(logits, axis=-1)
    logp = jnp.take_along_axis(logp, action, axis=-1)
    return value, action, logp, rnn_hxs


if __name__ == "__main__":
    key = jax.random.PRNGKey(0)
    kp, kx = jax.random.split(key)
    params = make_params(kp)
    packed = pack_params(params)

    x = jax.random.normal(kx, (T, B, OBS), jnp.float32)    # observations for T steps
    rnn_hxs = jnp.zeros((T, B, 1), jnp.float32)             # recurrent_hidden_state_size = 1
    masks = jnp.ones((T, B, 1), jnp.float32)

    value, action, logp, hxs = jax.block_until_ready(policy_act(packed, x, rnn_hxs, masks))
    v_ref, a_ref, lp_ref, _ = policy_act_ref(params, x, rnn_hxs, masks)

    assert value.shape == (T, B, 1) and action.shape == (T, B, 1) and logp.shape == (T, B, 1)
    assert jnp.allclose(value, v_ref, atol=1e-5)
    assert jnp.array_equal(action, a_ref)
    assert jnp.allclose(logp, lp_ref, atol=1e-5)

    print("KERNEL_OK")
</pallas_src>

<mosaic_0001>
module attributes {stable_mosaic.version = 11 : i64} {
  func.func @policy_act_kernel(%arg0: i32, %arg1: memref<1x8x16xf32, #tpu.memory_space<vmem>>, %arg2: memref<16x128xf32, #tpu.memory_space<vmem>>, %arg3: memref<128x128xf32, #tpu.memory_space<vmem>>, %arg4: memref<128x9xf32, #tpu.memory_space<vmem>>, %arg5: memref<3x128xf32, #tpu.memory_space<vmem>>, %arg6: memref<1x8x2xf32, #tpu.memory_space<vmem>>, %arg7: memref<1x8x1xi32, #tpu.memory_space<vmem>>) attributes {dimension_semantics = [#tpu.dimension_semantics<parallel>], iteration_bounds = array<i64: 4>, scalar_prefetch = 0 : i64, scratch_operands = 0 : i64, tpu.core_type = #tpu.core_type<tc>, window_params = [{transform_indices = @transform_0, window_bounds = array<i64: 1, 8, 16>}, {pipeline_mode = #tpu.pipeline_mode<synchronous>, transform_indices = @transform_1, window_bounds = array<i64: 16, 128>}, {pipeline_mode = #tpu.pipeline_mode<synchronous>, transform_indices = @transform_2, window_bounds = array<i64: 128, 128>}, {pipeline_mode = #tpu.pipeline_mode<synchronous>, transform_indices = @transform_3, window_bounds = array<i64: 128, 9>}, {pipeline_mode = #tpu.pipeline_mode<synchronous>, transform_indices = @transform_4, window_bounds = array<i64: 3, 128>}, {transform_indices = @transform_5, window_bounds = array<i64: 1, 8, 2>}, {transform_indices = @transform_6, window_bounds = array<i64: 1, 8, 1>}]} {
    %c0 = arith.constant 0 : index
    %c0_0 = arith.constant 0 : index
    %c0_1 = arith.constant 0 : index
    %0 = vector.load %arg1[%c0, %c0_0, %c0_1] : memref<1x8x16xf32, #tpu.memory_space<vmem>>, vector<1x8x16xf32>
    %1 = vector.shape_cast %0 : vector<1x8x16xf32> to vector<8x16xf32>
    %c0_2 = arith.constant 0 : index
    %c0_3 = arith.constant 0 : index
    %2 = vector.load %arg5[%c0_2, %c0_3] : memref<3x128xf32, #tpu.memory_space<vmem>>, vector<3x128xf32>
    %c0_4 = arith.constant 0 : index
    %c0_5 = arith.constant 0 : index
    %3 = vector.load %arg2[%c0_4, %c0_5] : memref<16x128xf32, #tpu.memory_space<vmem>>, vector<16x128xf32>
    %cst = arith.constant dense<0.000000e+00> : vector<8x128xf32>
    %4 = tpu.matmul %1, %3, %cst {dimension_numbers = #tpu.dot_dimension_numbers<[1], [0], [0], [1], [0, 0, 1, 1], [], []>} : vector<8x16xf32>, vector<16x128xf32>, vector<8x128xf32> -> vector<8x128xf32>
    %5 = vector.extract_strided_slice %2 {offsets = [0, 0], sizes = [1, 128], strides = [1, 1]} : vector<3x128xf32> to vector<1x128xf32>
    %6 = vector.broadcast %5 : vector<1x128xf32> to vector<8x128xf32>
    %7 = arith.addf %4, %6 : vector<8x128xf32>
    %8 = math.tanh %7 : vector<8x128xf32>
    %c0_6 = arith.constant 0 : index
    %c0_7 = arith.constant 0 : index
    %9 = vector.load %arg3[%c0_6, %c0_7] : memref<128x128xf32, #tpu.memory_space<vmem>>, vector<128x128xf32>
    %cst_8 = arith.constant dense<0.000000e+00> : vector<8x128xf32>
    %10 = tpu.matmul %8, %9, %cst_8 {dimension_numbers = #tpu.dot_dimension_numbers<[1], [0], [0], [1], [0, 0, 1, 1], [], []>} : vector<8x128xf32>, vector<128x128xf32>, vector<8x128xf32> -> vector<8x128xf32>
    %11 = vector.extract_strided_slice %2 {offsets = [1, 0], sizes = [1, 128], strides = [1, 1]} : vector<3x128xf32> to vector<1x128xf32>
    %12 = vector.broadcast %11 : vector<1x128xf32> to vector<8x128xf32>
    %13 = arith.addf %10, %12 : vector<8x128xf32>
    %14 = math.tanh %13 : vector<8x128xf32>
    %c0_9 = arith.constant 0 : index
    %c0_10 = arith.constant 0 : index
    %15 = vector.load %arg4[%c0_9, %c0_10] : memref<128x9xf32, #tpu.memory_space<vmem>>, vector<128x9xf32>
    %cst_11 = arith.constant dense<0.000000e+00> : vector<8x9xf32>
    %16 = tpu.matmul %14, %15, %cst_11 {dimension_numbers = #tpu.dot_dimension_numbers<[1], [0], [0], [1], [0, 0, 1, 1], [], []>} : vector<8x128xf32>, vector<128x9xf32>, vector<8x9xf32> -> vector<8x9xf32>
    %17 = vector.extract_strided_slice %2 {offsets = [2, 0], sizes = [1, 9], strides = [1, 1]} : vector<3x128xf32> to vector<1x9xf32>
    %18 = vector.broadcast %17 : vector<1x9xf32> to vector<8x9xf32>
    %19 = arith.addf %16, %18 : vector<8x9xf32>
    %20 = vector.extract_strided_slice %19 {offsets = [0, 0], sizes = [8, 8], strides = [1, 1]} : vector<8x9xf32> to vector<8x8xf32>
    %21 = vector.extract_strided_slice %19 {offsets = [0, 8], sizes = [8, 1], strides = [1, 1]} : vector<8x9xf32> to vector<8x1xf32>
    %cst_12 = arith.constant dense<0xFF800000> : vector<8xf32>
    %22 = vector.multi_reduction <maximumf>, %20, %cst_12 [1] : vector<8x8xf32> to vector<8xf32>
    %23 = vector.shape_cast %22 : vector<8xf32> to vector<8x1xf32>
    %24 = tpu.iota {dimensions = array<i32: 1>} : vector<8x8xi32>
    %25 = vector.broadcast %23 : vector<8x1xf32> to vector<8x8xf32>
    %26 = arith.cmpf oeq, %20, %25 : vector<8x8xf32>
    %c8_i32 = arith.constant 8 : i32
    %27 = vector.broadcast %c8_i32 : i32 to vector<8x8xi32>
    %28 = arith.select %26, %24, %27 : vector<8x8xi1>, vector<8x8xi32>
    %cst_13 = arith.constant dense<2147483647> : vector<8xi32>
    %29 = vector.multi_reduction <minsi>, %28, %cst_13 [1] : vector<8x8xi32> to vector<8xi32>
    %30 = vector.shape_cast %29 : vector<8xi32> to vector<8x1xi32>
    %31 = vector.broadcast %23 : vector<8x1xf32> to vector<8x8xf32>
    %32 = arith.subf %20, %31 : vector<8x8xf32>
    %33 = math.exp %32 : vector<8x8xf32>
    %cst_14 = arith.constant dense<0.000000e+00> : vector<8xf32>
    %34 = vector.multi_reduction <add>, %33, %cst_14 [1] : vector<8x8xf32> to vector<8xf32>
    %35 = vector.shape_cast %34 : vector<8xf32> to vector<8x1xf32>
    %36 = math.log %35 : vector<8x1xf32>
    %37 = arith.addf %36, %23 : vector<8x1xf32>
    %38 = arith.subf %23, %37 : vector<8x1xf32>
    %39 = tpu.concatenate %21, %38 in 1 : vector<8x1xf32>, vector<8x1xf32> -> vector<8x2xf32>
    %c0_15 = arith.constant 0 : index
    %c0_16 = arith.constant 0 : index
    %c0_17 = arith.constant 0 : index
    %40 = vector.load %arg6[%c0_15, %c0_16, %c0_17] : memref<1x8x2xf32, #tpu.memory_space<vmem>>, vector<1x8x2xf32>
    %41 = vector.shape_cast %40 : vector<1x8x2xf32> to vector<8x2xf32>
    %42 = vector.shape_cast %39 : vector<8x2xf32> to vector<1x8x2xf32>
    tpu.vector_store %arg6[%c0_15, %c0_16, %c0_17], %42 {strides = array<i32>} : memref<1x8x2xf32, #tpu.memory_space<vmem>>, vector<1x8x2xf32>,
    %c0_18 = arith.constant 0 : index
    %c0_19 = arith.constant 0 : index
    %c0_20 = arith.constant 0 : index
    %43 = vector.load %arg7[%c0_18, %c0_19, %c0_20] : memref<1x8x1xi32, #tpu.memory_space<vmem>>, vector<1x8x1xi32>
    %44 = vector.shape_cast %43 : vector<1x8x1xi32> to vector<8x1xi32>
    %45 = vector.shape_cast %30 : vector<8x1xi32> to vector<1x8x1xi32>
    tpu.vector_store %arg7[%c0_18, %c0_19, %c0_20], %45 {strides = array<i32>} : memref<1x8x1xi32, #tpu.memory_space<vmem>>, vector<1x8x1xi32>,
    return
  }
  func.func @transform_0(%arg0: i32) -> (i32, i32, i32) {
    %c0_i32 = arith.constant 0 : i32
    %c0_i32_0 = arith.constant 0 : i32
    %c0_i32_1 = arith.constant 0 : i32
    return %arg0, %c0_i32, %c0_i32_0 : i32, i32, i32
  }
  func.func @transform_1(%arg0: i32) -> (i32, i32) {
    %c0_i32 = arith.constant 0 : i32
    %c0_i32_0 = arith.constant 0 : i32
    %c0_i32_1 = arith.constant 0 : i32
    return %c0_i32, %c0_i32_0 : i32, i32
  }
  func.func @transform_2(%arg0: i32) -> (i32, i32) {
    %c0_i32 = arith.constant 0 : i32
    %c0_i32_0 = arith.constant 0 : i32
    %c0_i32_1 = arith.constant 0 : i32
    return %c0_i32, %c0_i32_0 : i32, i32
  }
  func.func @transform_3(%arg0: i32) -> (i32, i32) {
    %c0_i32 = arith.constant 0 : i32
    %c0_i32_0 = arith.constant 0 : i32
    %c0_i32_1 = arith.constant 0 : i32
    return %c0_i32, %c0_i32_0 : i32, i32
  }
  func.func @transform_4(%arg0: i32) -> (i32, i32) {
    %c0_i32 = arith.constant 0 : i32
    %c0_i32_0 = arith.constant 0 : i32
    %c0_i32_1 = arith.constant 0 : i32
    return %c0_i32, %c0_i32_0 : i32, i32
  }
  func.func @transform_5(%arg0: i32) -> (i32, i32, i32) {
    %c0_i32 = arith.constant 0 : i32
    %c0_i32_0 = arith.constant 0 : i32
    %c0_i32_1 = arith.constant 0 : i32
    return %arg0, %c0_i32, %c0_i32_0 : i32, i32, i32
  }
  func.func @transform_6(%arg0: i32) -> (i32, i32, i32) {
    %c0_i32 = arith.constant 0 : i32
    %c0_i32_0 = arith.constant 0 : i32
    %c0_i32_1 = arith.constant 0 : i32
    return %arg0, %c0_i32, %c0_i32_0 : i32, i32, i32
  }
}

</mosaic_0001>

<bundles_post_ra>
// kernel: tpu_custom_call.1
= control target key start
LH: loop header
LB: loop body
LE: loop exit
PB: predicated region body
PF: predicated region fallthrough
CT: control target
= control target key end

     0   :  { %12 = vsyncpa [#allocation3], 0  ;;  %s1252_s0 = inlined_call_operand.hbm [shape: f32[4,8,16], index: 0, kind: input, shape index: {}]   ;;  %s1253_s1 = inlined_call_operand.vmem [shape: f32[16,128], index: 1, kind: input, shape index: {}]   ;;  %s1254_s2 = inlined_call_operand.vmem [shape: f32[128,128], index: 2, kind: input, shape index: {}]   ;;  %s1255_s3 = inlined_call_operand.vmem [shape: f32[128,9], index: 3, kind: input, shape index: {}]   ;;  %s1256_s4 = inlined_call_operand.vmem [shape: f32[3,128], index: 4, kind: input, shape index: {}]   ;;  %s1257_s5 = inlined_call_operand.vmem [shape: f32[4,8,2], index: 5, kind: output, shape index: {0}]   ;;  %s1258_s6 = inlined_call_operand.vmem [shape: s32[4,8,1], index: 6, kind: output, shape index: {1}]  }
   0x1   :  { %14 = vsyncpa [#allocation3 + $0x1], 0  ;;  %s1014_s21 = smov 0   ;;  %s1016_s22 = smov 0  }
   0x2   :  { %s1018_s23 = smov 0   ;;  %s1020_s24 = smov 0  }
   0x3 LB: > { %s1033_s25 = sadd.s32 4294967295, %s972_s24   ;;  %s1036_s26 = sadd.s32 1, %s972_s24   ;;  %s972_s24 = sphi %s1020_s24, %s1266_s24   ;;  %s968_s23 = sphi %s1018_s23, %s1265_s23   ;;  %s964_s22 = sphi %s1016_s22, %s1264_s22   ;;  %s960_s21 = sphi %s1014_s21, %s1263_s21  }
   0x4   : > { %s24_s27 = ssub.s32 %s972_s24, %s1036_s26  ;;  %s27_s28 = sadd.s32 1, %s968_s23 }
   0x5   : > { %p25_p0 = scmp.eq.s32.totalorder %s24_s27, 0  ;;  %p34_p1 = scmp.ne.s32.totalorder %s968_s23, %s964_s22 }
   0x6   : > { %p35_p2 = scmp.eq.s32.totalorder %s972_s24, 0  ;;  %p40_p3 = scmp.ne.s32.totalorder %s964_s22, %s960_s21 }
   0x7   : > { %s1046_s29 = scalar_select %p25_p0, %s968_s23, %s27_s28  }
   0x8   : > { %p36_p4 = por %p35_p2, %p34_p1  ;;  %p41_p5 = scmp.eq.s32.totalorder %s1033_s25, 0 }
   0x9   : > { %p863_p6 = scmp.lt.s32.totalorder %s972_s24, 4  ;;  %s212_s7 = sand.u32 1, %s968_s23  }
   0xa   : > { %p1050_p7 = por %p41_p5, %p40_p3  ;;  %s683_s8 = sshll.u32 %s212_s7, 3 }
   0xb   : > { %s684_s9 = sshll.u32 %s972_s24, 7  ;;  %s216_s13 = scalar_lea.vmem [#allocation2], %s683_s8 }
   0xc   : > { %s1059_s12 = scalar_lea.hbm %s1252_s0, %s684_s9  ;;  %s223_s14 = sshll.u32 %s216_s13, 4  ;;  %s1061_s14 = int_to_ptr.vmem [resolvable:$true] %s223_s14 }
   0xd   : > { %p1063_p8 = pnand %p863_p6, %p36_p4  ;;  %s213_s16 = scalar_lea.sflag [#allocation3], %s212_s7 }
   0xe   : > { %s908_s17 = scalar_lea.hbm %s1059_s12, 128  ;;  %s913_s20 = scalar_lea.hbm %s1252_s0, 512 }
   0xf   : > { %p909_p11 = scmp.ne.s32.totalorder %s1059_s12, %s908_s17  ;;  %p910_p12 = pneg %p1063_p8 }
  0x10   : > { %p914_p1 = scmp.lt.u32.totalorder %s1059_s12, %s1252_s0  ;;  %p915_p2 = scmp.lt.u32.totalorder %s913_s20, %s908_s17 }
  0x11   : > { %p911_p13 = pnand %p910_p12, %p909_p11  ;;  %p917_p4 = scmp.lt.u32.totalorder %s908_s17, %s1059_s12 }
  0x12   : > { %p916_p3 = por %p915_p2, %p914_p1 }
  0x13   : > { %p912_p0 = pneg %p911_p13 }
  0x14   : > { %p918_p5 = por %p917_p4, %p916_p3 }
  0x16   : > { %p919_p6 = pnand %p918_p5, %p912_p0 }
  0x18   : > { %922 = shalt.err (!%p919_p6)
}
  0x19   : > { %s923_s28 = scalar_lea.vmem %s1061_s14, 128  ;;  %s974_s7 = smov [#allocation2]  }
  0x1a   : > { %p924_p11 = scmp.ne.s32.totalorder %s1061_s14, %s923_s28  ;;  %s928_s8 = sshll.u32 %s974_s7, 4  ;;  %s929_s8 = int_to_ptr.vmem [resolvable:$false] %s928_s8 }
  0x1b   : > { %s930_s9 = scalar_lea.vmem %s929_s8, 256  ;;  %p931_p10 = scmp.lt.s32.totalorder %s1061_s14, %s929_s8 }
  0x1c   : > { %p926_p13 = pnand %p924_p11, %p910_p12  ;;  %p932_p1 = scmp.lt.s32.totalorder %s930_s9, %s923_s28 }
  0x1e   : > { %p927_p9 = pneg %p926_p13  ;;  %p933_p2 = por %p932_p1, %p931_p10 }
  0x20   : > { %p934_p3 = pnand %p933_p2, %p927_p9 }
  0x22   : > { %937 = shalt.err (!%p934_p3)
}
  0x23   : > { %862 = dma.hbm_to_vmem [thread:$0]  (!%p1063_p8), %s1059_s12, 128, %s1061_s14, %s213_s16  }
  0x24   : > { %p1261_p0 = scmp.lt.s32.totalorder %s972_s24, 5  ;;  %p1262_p4 = scmp.ge.s32.totalorder %s972_s24, 1 }
  0x26   : > { %p229_p12 = pnand %p1262_p4, %p1261_p0 }
  0x27   : > { %s234_s10 = sand.u32 (!%p229_p12), 1, %s964_s22  }
  0x28   : > { %232 = sbr.rel (%p229_p12) target bundleno = 1159 (0x487), region = 40  ;;  %s686_s11 = sshll.u32 (!%p229_p12), %s234_s10, 3 }
  0x29   : > { %s235_s13 = scalar_lea.sflag (!%p229_p12), [#allocation3], %s234_s10  ;;  %s238_s17 = scalar_lea.vmem (!%p229_p12), [#allocation2], %s686_s11 }
  0x2f   : > { %955 = dma.done.wait (%p1050_p7), %s235_s13, 128  }
  0x30   : > { %957 = vsyncadd (%p1050_p7), %s235_s13, 4294967168  ;;  %v975_v0 = vmov 0.0|0.0   ;;  %vm976_vm0 = vmmov 0   ;;  %v977_v1 = vmov 0.0   ;;  %v280_v2 = vld [vmem:[%s1253_s1] sm:$0xff]  ;;  %v281_v3 = vld [vmem:[%s1253_s1 + $0x8] sm:$0xff]  ;;  %v282_v45 = vlaneseq }
  0x31   : > { %806 = vmatprep.subr.bf16.mxu0 %v975_v0  ;;  %733 = vmatprep.mubr.msk.f32.mxu0 %vm976_vm0, %v977_v1  ;;  %v807_v4 = vpack.c.bf16 %v281_v3, %v280_v2  ;;  %v361_v5 = vld [vmem:[%s1254_s2] sm:$0xff]  ;;  %v362_v6 = vld [vmem:[%s1254_s2 + $0x8] sm:$0xff]  ;;  %v363_v7 = vld [vmem:[%s1254_s2 + $0x10] sm:$0xff]  ;;  %vm286_vm1 = vcmask 130048   ;;  %vm542_vm2 = vcmask 64512   ;;  %s978_s8 = smov 120  }
  0x32   : > { %809 = vmatprep.subr.bf16.mxu1 %v975_v0  ;;  %768 = vmatprep.mubr.msk.f32.mxu1 %vm976_vm0, %v977_v1  ;;  %v810_v8 = vpack.c.bf16 %v362_v6, %v361_v5  ;;  %v364_v9 = vld [vmem:[%s1254_s2 + $0x18] sm:$0xff]  ;;  %v278_v10 = vld [vmem:[%s238_s17] sm:$0xff]  ;;  %v367_v15 = vld [vmem:[%s1254_s2 + $0x30] sm:$0xff]  ;;  %v283_v46 = vshrl.u32 %v282_v45, 7  ;;  %p270_p7 = scmp.lt.s32.totalorder %s1033_s25, 3  ;;  %vm579_vm5 = vcmask 7168  }
  0x33   : > { %808 = vmatpush3.bf16.msra.mxu0 %v807_v4  ;;  %v813_v11 = vpack.c.bf16 %v364_v9, %v363_v7  ;;  %v365_v12 = vld [vmem:[%s1254_s2 + $0x20] sm:$0xff]  ;;  %v366_v13 = vld [vmem:[%s1254_s2 + $0x28] sm:$0xff]  ;;  %v368_v16 = vld [vmem:[%s1254_s2 + $0x38] sm:$0xff]  ;;  %vm581_vm6 = vcmask 15360  }
  0x34   : > { %811 = vmatpush3.bf16.msra.mxu1 %v810_v8  ;;  %833 = vmatprep.subr.bf16.mxu0 %v975_v0  ;;  %v816_v14 = vpack.c.bf16 %v366_v13, %v365_v12  ;;  %v819_v17 = vpack.c.bf16 %v368_v16, %v367_v15  ;;  %v369_v18 = vld [vmem:[%s1254_s2 + $0x40] sm:$0xff]  ;;  %v370_v19 = vld [vmem:[%s1254_s2 + $0x48] sm:$0xff]  ;;  %v371_v21 = vld [vmem:[%s1254_s2 + $0x50] sm:$0xff]  ;;  %v284_v47 = vsub.s32 0, %v283_v46  ;;  %v379_v63 = vsub.s32 1, %v283_v46  ;;  %s1268_s25 = smov (!%p270_p7, %s1033_s25), 3 }
  0x35   : > { %812 = vmatprep.subr.bf16.mxu1 %v975_v0  ;;  %v822_v20 = vpack.c.bf16 %v370_v19, %v369_v18  ;;  %v372_v22 = vld [vmem:[%s1254_s2 + $0x58] sm:$0xff]  ;;  %v373_v24 = vld [vmem:[%s1254_s2 + $0x60] sm:$0xff]  ;;  %v374_v25 = vld [vmem:[%s1254_s2 + $0x68] sm:$0xff]  ;;  %v470_v6 = vsub.s32 2, %v283_v46  ;;  %v547_v12 = vand.u32 127, %v282_v45  ;;  %s687_s9 = sshll.u32 %s1268_s25, 3 }
  0x36   : > { %734 = vmatmul.mubr.msk.f32.vlgmr.msra.gmra.mrb[0].mxu0 %vm286_vm1, %v278_v10  ;;  %v825_v23 = vpack.c.bf16 %v372_v22, %v371_v21  ;;  %v828_v26 = vpack.c.bf16 %v374_v25, %v373_v24  ;;  %v375_v27 = vld [vmem:[%s1254_s2 + $0x70] sm:$0xff]  ;;  %v376_v28 = vld [vmem:[%s1254_s2 + $0x78] sm:$0xff]  ;;  %v452_v30 = vld [vmem:[%s1255_s3] sm:$0xff]  ;;  %s273_s13 = scalar_lea.vmem %s1257_s5, %s687_s9  ;;  %s277_s12 = scalar_lea.vmem %s1258_s6, %s687_s9 }
  0x37   : > { %803 = vmatprep.mubr.msk.f32.mxu0 %vm976_vm0, %v977_v1  ;;  %v831_v29 = vpack.c.bf16 %v376_v28, %v375_v27  ;;  %v453_v31 = vld [vmem:[%s1255_s3 + $0x8] sm:$0xff]  ;;  %v454_v32 = vld [vmem:[%s1255_s3 + $0x10] sm:$0xff]  ;;  %v455_v34 = vld [vmem:[%s1255_s3 + $0x18] sm:$0xff] }
  0x38   : > { %814 = vmatpush3.bf16.msra.mxu1 %v813_v11  ;;  %v834_v33 = vpack.c.bf16 %v453_v31, %v452_v30  ;;  %v837_v35 = vpack.c.bf16 %v455_v34, %v454_v32  ;;  %v456_v36 = vld [vmem:[%s1255_s3 + $0x20] sm:$0xff]  ;;  %v457_v37 = vld [vmem:[%s1255_s3 + $0x28] sm:$0xff]  ;;  %v458_v39 = vld [vmem:[%s1255_s3 + $0x30] sm:$0xff] }
  0x39   : > { %815 = vmatprep.subr.bf16.mxu1 %v975_v0  ;;  %v840_v38 = vpack.c.bf16 %v457_v37, %v456_v36  ;;  %v459_v40 = vld [vmem:[%s1255_s3 + $0x38] sm:$0xff]  ;;  %v460_v42 = vld [vmem:[%s1255_s3 + $0x40] sm:$0xff]  ;;  %v461_v43 = vld [vmem:[%s1255_s3 + $0x48] sm:$0xff] }
  0x3a   : > { %835 = vmatpush3.bf16.msra.mxu0 %v834_v33  ;;  %v843_v41 = vpack.c.bf16 %v459_v40, %v458_v39  ;;  %v846_v44 = vpack.c.bf16 %v461_v43, %v460_v42  ;;  %v279_v48 = vld [vmem:[%s1256_s4] sm:$0x7]  ;;  %v462_v54 = vld [vmem:[%s1255_s3 + $0x50] sm:$0xff]  ;;  %v463_v55 = vld [vmem:[%s1255_s3 + $0x58] sm:$0xff] }
  0x3b   : > { %836 = vmatprep.subr.bf16.mxu0 %v975_v0  ;;  %v285_v49 = vrot.slane %v279_v48, %v284_v47  ;;  %v849_v56 = vpack.c.bf16 %v463_v55, %v462_v54  ;;  %v464_v57 = vld [vmem:[%s1255_s3 + $0x60] sm:$0xff]  ;;  %v465_v58 = vld [vmem:[%s1255_s3 + $0x68] sm:$0xff]  ;;  %v466_v60 = vld [vmem:[%s1255_s3 + $0x70] sm:$0xff]  ;;  %v380_v1 = vrot.slane %v279_v48, %v379_v63  ;;  %v471_v7 = vrot.slane %v279_v48, %v470_v6 }
  0x3c   : > { %817 = vmatpush3.bf16.msra.mxu1 %v816_v14  ;;  %v852_v59 = vpack.c.bf16 %v465_v58, %v464_v57  ;;  %v467_v61 = vld [vmem:[%s1255_s3 + $0x78] sm:$0xff] }
  0x3d   : > { %818 = vmatprep.subr.bf16.mxu1 %v975_v0  ;;  %v855_v62 = vpack.c.bf16 %v467_v61, %v466_v60 }
  0x3e   : > { %838 = vmatpush3.bf16.msra.mxu0 %v837_v35 }
  0x3f   : > { %839 = vmatprep.subr.bf16.mxu0 %v975_v0 }
  0x40   : > { %820 = vmatpush3.bf16.msra.mxu1 %v819_v17 }
  0x41   : > { %821 = vmatprep.subr.bf16.mxu1 %v975_v0 }
  0x42   : > { %841 = vmatpush3.bf16.msra.mxu0 %v840_v38 }
  0x43   : > { %842 = vmatprep.subr.bf16.mxu0 %v975_v0 }
  0x44   : > { %823 = vmatpush3.bf16.msra.mxu1 %v822_v20 }
  0x45   : > { %824 = vmatprep.subr.bf16.mxu1 %v975_v0 }
  0x46   : > { %844 = vmatpush3.bf16.msra.mxu0 %v843_v41 }
  0x47   : > { %845 = vmatprep.subr.bf16.mxu0 %v975_v0 }
  0x48   : > { %826 = vmatpush3.bf16.msra.mxu1 %v825_v23 }
  0x49   : > { %827 = vmatprep.subr.bf16.mxu1 %v975_v0 }
  0x4a   : > { %847 = vmatpush3.bf16.msra.mxu0 %v846_v44 }
  0x4b   : > { %848 = vmatprep.subr.bf16.mxu0 %v975_v0 }
  0x4c   : > { %829 = vmatpush3.bf16.msra.mxu1 %v828_v26 }
  0x4d   : > { %830 = vmatprep.subr.bf16.mxu1 %v975_v0 }
  0x4e   : > { %850 = vmatpush3.bf16.msra.mxu0 %v849_v56 }
  0x4f   : > { %851 = vmatprep.subr.bf16.mxu0 %v975_v0 }
  0x50   : > { %832 = vmatpush3.bf16.msra.mxu1 %v831_v29 }
  0x52   : > { %853 = vmatpush3.bf16.msra.mxu0 %v852_v59 }
  0x53   : > { %854 = vmatprep.subr.bf16.mxu0 %v975_v0 }
  0x56   : > { %856 = vmatpush3.bf16.msra.mxu0 %v855_v62 }
 0x109   : > { %v356_v50 = vpop.f32.mrb[0].mxu0 }
 0x10a   : > { %v357_v51 = vadd.f32 %v356_v50, %v285_v49  ;;  %v735_v52 = vpop.f32.mrb[1].mxu0 }
 0x10c   : > { %900 = vtanh.f32 %v357_v51 }
 0x116   : > { %v901_v53 = vpop.eup %900 }
 0x117   : > { %769 = vmatmul.mubr.f32.vlgmr.msra.gmra.mrb[0].mxu1 %v901_v53 }
 0x1ea   : > { %v447_v2 = vpop.f32.mrb[0].mxu1 }
 0x1eb   : > { %v448_v3 = vadd.f32 %v447_v2, %v380_v1  ;;  %v770_v4 = vpop.f32.mrb[1].mxu1 }
 0x1ed   : > { %902 = vtanh.f32 %v448_v3 }
 0x1f7   : > { %v903_v5 = vpop.eup %902 }
 0x1f8   : > { %804 = vmatmul.mubr.f32.vlgmr.msra.gmra.mrb[2].mxu0 %v903_v5 }
 0x2cb   : > { %v538_v8 = vpop.f32.mrb[2].mxu0 }
 0x2cc   : > { %v539_v9 = vadd.f32 %v538_v8, %v471_v7  ;;  %v805_v10 = vpop.f32.mrb[3].mxu0 }
 0x2ce   : > { %v543_v11 = vsel %vm542_vm2, %v539_v9, -inf }
 0x2cf   : > { %544 = vmax.xlane.f32.xlu0 %v543_v11 }
 0x35c   : > { %v545_v0 = vpop.xlane.xlu0 %544 }
 0x35d   : > { %v565_v13 = vsub.f32 %v539_v9, %v545_v0  ;;  %vm548_vm3 = vcmp.eq.f32.partialorder %v539_v9, %v545_v0 }
 0x35e   : > { %v549_v14 = vsel %vm548_vm3, %v547_v12, 8 }
 0x35f   : > { %v566_v15 = vmul.f32 1.442695, %v565_v13  ;;  %v550_v16 = vsel %vm542_vm2, %v549_v14, 2147483647 }
 0x360   : > { %v552_v17 = vshra.s32 %v550_v16, 16  ;;  %v551_v21 = vand.u32 65535, %v550_v16 }
 0x361   : > { %904 = vpow2.f32 %v566_v15 }
 0x362   : > { %v554_v18 = vcvt.s32.f32 %v552_v17  ;;  %v553_v23 = vcvt.s32.f32 %v551_v21 }
 0x364   : > { %555 = vmin.xlane.f32.xlu0 %v554_v18 }
 0x36b   : > { %v905_v19 = vpop.eup %904 }
 0x36c   : > { %v568_v20 = vsel %vm542_vm2, %v905_v19, 0.0 }
 0x36d   : > { %569 = vadd.xlane.f32.xlu1 %v568_v20 }
 0x37a   : > { %576 = vrot.lane.b32.xlu0 %v539_v9, %s978_s8 }
 0x3f1   : > { %v556_v22 = vpop.xlane.xlu0 %555 }
 0x3f2   : > { %vm557_vm4 = vcmp.eq.f32.partialorder %v554_v18, %v556_v22  ;;  %v562_v32 = vcvt.f32.s32 %v556_v22 }
 0x3f3   : > { %v558_v24 = vsel %vm557_vm4, %v553_v23, inf }
 0x3f4   : > { %559 = vmin.xlane.f32.xlu1 %v558_v24  ;;  %v563_v34 = vshll.u32 %v562_v32, 16 }
 0x3f5   : > { %v577_v30 = vpop.permute.xlu0 %576 }
 0x3fa   : > { %v570_v25 = vpop.xlane.xlu1 %569 }
 0x3fb   : > { %906 = vlog2.f32 %v570_v25 }
 0x405   : > { %v907_v26 = vpop.eup %906 }
 0x406   : > { %v572_v27 = vmul.f32 0.6931472, %v907_v26 }
 0x408   : > { %v573_v28 = vadd.f32 %v572_v27, %v545_v0 }
 0x40a   : > { %v574_v29 = vsub.f32 %v545_v0, %v573_v28 }
 0x40c   : > { %v580_v31 = vsel %vm579_vm5, %v577_v30, %v574_v29 }
 0x40d   : > { %582 = vst.msk [vmem:[%s273_s13] sm:$0xff] %vm581_vm6, %v580_v31 }
 0x481   : > { %v560_v33 = vpop.xlane.xlu1 %559 }
 0x482   : > { %v561_v35 = vcvt.f32.s32 %v560_v33 }
 0x484   : > { %v564_v36 = vadd.s32 %v563_v34, %v561_v35 }
 0x486   : > { %583 = vst.msk [vmem:[%s277_s12] sm:$0xff] %vm579_vm5, %v564_v36 }
 0x487 PF: > { %p17_p8 = scmp.ge.s32.totalorder %s1036_s26, 6   ;;  %s1263_s21 = smov %s964_s22 }
 0x488   : > { %s1264_s22 = smov %s968_s23  ;;  %s1265_s23 = smov %s1046_s29 }
 0x489   : > { %s1266_s24 = smov %s1036_s26  ;;  %19 = sbr.rel (!%p17_p8) target bundleno = 3 (0x3), region = 92 }
 0x490   :  { %617 = vsyncpa [#allocation3], 1 }
 0x491   :  { %619 = vsyncpa [#allocation3 + $0x1], 1 }

</bundles_post_ra>
